<compile_context>
chip_gen: v7x
topology: tpu7x:2x2x1
jax: 0.10.0
libtpu: 0.0.40
codegen_flags: <defaults>
</compile_context>

<pallas_src>
import math

import jax
import jax.numpy as jnp
from jax.experimental import pallas as pl
from jax.experimental.pallas import tpu as pltpu

_TWO_PI = 2.0 * math.pi
_MAX_ROW_TILE = 512  # sublane rows per grid step (512*128*4 B = 256 KiB per slab)


def _box_muller_kernel(bits_ref, o_ref):
    """bits_ref: (2, T, 128) uint32 -> o_ref: (2, T, 128) f32 iid N(0,1)."""
    exp_one = jnp.uint32(0x3F800000)

    # Mantissa trick: 23 random mantissa bits with exponent of 1.0 -> [1, 2).
    f1 = jax.lax.bitcast_convert_type((bits_ref[0] >> 9) | exp_one, jnp.float32)
    f2 = jax.lax.bitcast_convert_type((bits_ref[1] >> 9) | exp_one, jnp.float32)

    u1 = 2.0 - f1               # (0, 1]  -> log() is always finite
    theta = (f2 - 1.0) * _TWO_PI  # [0, 2*pi)

    r = jnp.sqrt(-2.0 * jnp.log(u1))
    # Full Box-Muller pair: cos and sin branches are independent N(0,1).
    o_ref[0] = r * jnp.cos(theta)
    o_ref[1] = r * jnp.sin(theta)


def random_model_forward(x, n_out, key):
    """Pallas equivalent of RandomModel.forward: returns randn(B, n_out)."""
    batch = x.shape[0]
    total = batch * n_out

    # Each (u1, u2) pair yields two normals -> draw bits for half the outputs,
    # laid out lane-dense: (rows, 128) with rows a multiple of 8 (and of the
    # grid tile size so every grid step is full).
    n_half = -(-total // 2)
    rows = -(-n_half // 128)
    rows = -(-rows // 8) * 8
    row_tile = min(rows, _MAX_ROW_TILE)
    rows = -(-rows // row_tile) * row_tile
    grid = (rows // row_tile,)

    bits = jax.random.bits(key, (2, rows, 128), dtype=jnp.uint32)

    slab = pl.pallas_call(
        _box_muller_kernel,
        out_shape=jax.ShapeDtypeStruct((2, rows, 128), jnp.float32),
        grid=grid,
        in_specs=[pl.BlockSpec((2, row_tile, 128), lambda i: (0, i, 0))],
        out_specs=pl.BlockSpec((2, row_tile, 128), lambda i: (0, i, 0)),
        compiler_params=pltpu.CompilerParams(
            dimension_semantics=("parallel",),
        ),
    )(bits)

    # Free layout plumbing: flatten the lane-dense slab and take the first
    # total samples (all entries are iid standard normal).
    return slab.reshape(-1)[:total].reshape(batch, n_out)


if __name__ == "__main__":
    # Small shapes consistent with an NCHW conv-style input.
    B, C, H, W = 2, 4, 16, 16
    n_out = 32

    key = jax.random.PRNGKey(0)
    x_key, rng_key = jax.random.split(key)
    x = jax.random.normal(x_key, (B, C, H, W), dtype=jnp.float32)  # contents ignored

    y = random_model_forward(x, n_out, rng_key)
    y = jax.block_until_ready(y)

    assert y.shape == (B, n_out), y.shape
    assert y.dtype == jnp.float32, y.dtype
    # Sanity: samples should not be constant, be roughly centered, and finite.
    assert bool(jnp.all(jnp.isfinite(y)))
    assert bool(jnp.std(y) > 0.1)
    assert bool(jnp.abs(jnp.mean(y)) < 1.0)

    print("KERNEL_OK")
</pallas_src>

<mosaic_0001>
module attributes {stable_mosaic.version = 11 : i64} {
  func.func @_box_muller_kernel(%arg0: i32, %arg1: memref<2x8x128xi32, #tpu.memory_space<vmem>>, %arg2: memref<2x8x128xf32, #tpu.memory_space<vmem>>) attributes {dimension_semantics = [#tpu.dimension_semantics<parallel>], iteration_bounds = array<i64: 1>, scalar_prefetch = 0 : i64, scratch_operands = 0 : i64, tpu.core_type = #tpu.core_type<tc>, window_params = [{transform_indices = @transform_0, window_bounds = array<i64: 2, 8, 128>}, {transform_indices = @transform_1, window_bounds = array<i64: 2, 8, 128>}]} {
    %c0 = arith.constant 0 : index
    %c0_0 = arith.constant 0 : index
    %c0_1 = arith.constant 0 : index
    %0 = vector.load %arg1[%c0, %c0_0, %c0_1] : memref<2x8x128xi32, #tpu.memory_space<vmem>>, vector<1x8x128xi32>
    %1 = vector.shape_cast %0 : vector<1x8x128xi32> to vector<8x128xi32>
    %c9_i32 = arith.constant 9 : i32
    %2 = vector.broadcast %c9_i32 : i32 to vector<8x128xi32>
    %3 = arith.shrui %1, %2 : vector<8x128xi32>
    %c1065353216_i32 = arith.constant 1065353216 : i32
    %4 = vector.broadcast %c1065353216_i32 : i32 to vector<8x128xi32>
    %5 = arith.ori %3, %4 : vector<8x128xi32>
    %6 = tpu.bitcast %5 : vector<8x128xi32> -> vector<8x128xf32>
    %c1 = arith.constant 1 : index
    %c0_2 = arith.constant 0 : index
    %c0_3 = arith.constant 0 : index
    %7 = vector.load %arg1[%c1, %c0_2, %c0_3] : memref<2x8x128xi32, #tpu.memory_space<vmem>>, vector<1x8x128xi32>
    %8 = vector.shape_cast %7 : vector<1x8x128xi32> to vector<8x128xi32>
    %c9_i32_4 = arith.constant 9 : i32
    %9 = vector.broadcast %c9_i32_4 : i32 to vector<8x128xi32>
    %10 = arith.shrui %8, %9 : vector<8x128xi32>
    %c1065353216_i32_5 = arith.constant 1065353216 : i32
    %11 = vector.broadcast %c1065353216_i32_5 : i32 to vector<8x128xi32>
    %12 = arith.ori %10, %11 : vector<8x128xi32>
    %13 = tpu.bitcast %12 : vector<8x128xi32> -> vector<8x128xf32>
    %cst = arith.constant 2.000000e+00 : f32
    %14 = vector.broadcast %cst : f32 to vector<8x128xf32>
    %15 = arith.subf %14, %6 : vector<8x128xf32>
    %cst_6 = arith.constant 1.000000e+00 : f32
    %16 = vector.broadcast %cst_6 : f32 to vector<8x128xf32>
    %17 = arith.subf %13, %16 : vector<8x128xf32>
    %cst_7 = arith.constant 6.28318548 : f32
    %18 = vector.broadcast %cst_7 : f32 to vector<8x128xf32>
    %19 = arith.mulf %17, %18 : vector<8x128xf32>
    %20 = math.log %15 : vector<8x128xf32>
    %cst_8 = arith.constant -2.000000e+00 : f32
    %21 = vector.broadcast %cst_8 : f32 to vector<8x128xf32>
    %22 = arith.mulf %21, %20 : vector<8x128xf32>
    %23 = math.sqrt %22 : vector<8x128xf32>
    %24 = math.cos %19 : vector<8x128xf32>
    %25 = arith.mulf %23, %24 : vector<8x128xf32>
    %c0_9 = arith.constant 0 : index
    %c0_10 = arith.constant 0 : index
    %c0_11 = arith.constant 0 : index
    %26 = vector.load %arg2[%c0_9, %c0_10, %c0_11] : memref<2x8x128xf32, #tpu.memory_space<vmem>>, vector<1x8x128xf32>
    %27 = vector.shape_cast %26 : vector<1x8x128xf32> to vector<8x128xf32>
    %28 = vector.shape_cast %25 : vector<8x128xf32> to vector<1x8x128xf32>
    tpu.vector_store %arg2[%c0_9, %c0_10, %c0_11], %28 {strides = array<i32>} : memref<2x8x128xf32, #tpu.memory_space<vmem>>, vector<1x8x128xf32>,
    %29 = math.sin %19 : vector<8x128xf32>
    %30 = arith.mulf %23, %29 : vector<8x128xf32>
    %c1_12 = arith.constant 1 : index
    %c0_13 = arith.constant 0 : index
    %c0_14 = arith.constant 0 : index
    %31 = vector.load %arg2[%c1_12, %c0_13, %c0_14] : memref<2x8x128xf32, #tpu.memory_space<vmem>>, vector<1x8x128xf32>
    %32 = vector.shape_cast %31 : vector<1x8x128xf32> to vector<8x128xf32>
    %33 = vector.shape_cast %30 : vector<8x128xf32> to vector<1x8x128xf32>
    tpu.vector_store %arg2[%c1_12, %c0_13, %c0_14], %33 {strides = array<i32>} : memref<2x8x128xf32, #tpu.memory_space<vmem>>, vector<1x8x128xf32>,
    return
  }
  func.func @transform_0(%arg0: i32) -> (i32, i32, i32) {
    %c0_i32 = arith.constant 0 : i32
    %c0_i32_0 = arith.constant 0 : i32
    %c0_i32_1 = arith.constant 0 : i32
    return %c0_i32, %arg0, %c0_i32_0 : i32, i32, i32
  }
  func.func @transform_1(%arg0: i32) -> (i32, i32, i32) {
    %c0_i32 = arith.constant 0 : i32
    %c0_i32_0 = arith.constant 0 : i32
    %c0_i32_1 = arith.constant 0 : i32
    return %c0_i32, %arg0, %c0_i32_0 : i32, i32, i32
  }
}

</mosaic_0001>

<bundles_post_ra>
// kernel: tpu_custom_call.1
= control target key start
LH: loop header
LB: loop body
LE: loop exit
PB: predicated region body
PF: predicated region fallthrough
CT: control target
= control target key end

     0   :  { %6 = vsyncpa [#allocation3], 0  ;;  %s424_s0 = inlined_call_operand.hbm [shape: u32[2,8,128], index: 0, kind: input, shape index: {}]   ;;  %s425_s1 = inlined_call_operand.hbm [shape: f32[2,8,128], index: 1, kind: output, shape index: {}]  }
   0x1   :  { %7 = vsyncpa [#allocation4], 0  ;;  %s353_s6 = smov [#allocation2]   ;;  %s305_s10 = scalar_lea.hbm %s424_s0, 256 }
   0x2   :  { %s13_s7 = sshll.u32 %s353_s6, 4  ;;  %p306_p0 = scmp.ne.s32.totalorder %s424_s0, %s305_s10  ;;  %s14_s7 = int_to_ptr.vmem [resolvable:$true] %s13_s7 }
   0x3   :  { %p309_p1 = scmp.lt.u32.totalorder %s305_s10, %s424_s0 }
   0x5   :  { %p311_p2 = pnand %p309_p1, %p306_p0 }
   0x7   :  { %314 = shalt.err (!%p311_p2)
}
   0x8   :  { %s315_s15 = scalar_lea.vmem %s14_s7, 256  ;;  %p320_p4 = scmp.lt.s32.totalorder %s14_s7, %s14_s7 }
   0x9   :  { %p316_p3 = scmp.ne.s32.totalorder %s14_s7, %s315_s15  ;;  %p321_p5 = scmp.lt.s32.totalorder %s315_s15, %s315_s15 }
   0xb   :  { %p322_p6 = por %p321_p5, %p320_p4 }
   0xd   :  { %p323_p7 = pnand %p322_p6, %p316_p3 }
   0xf   :  { %326 = shalt.err (!%p323_p7)
}
  0x10   :  { %s354_s16 = smov 128   ;;  %s355_s17 = smov 8  }
  0x11   :  { %19 = dma.hbm_to_vmem [thread:$0]  %s424_s0, 256, %s14_s7, [#allocation3], %s354_s16, %s354_s16, %s355_s17  }
  0x12   :  { %349 = dma.done.wait [#allocation3], 256  }
  0x13   :  { %350 = vsyncadd [#allocation3], 4294967040  ;;  %v28_v0 = vld [vmem:[#allocation2 + $0x8] sm:$0xff]  ;;  %v356_v16 = vmov 683565275   ;;  %v23_v55 = vld [vmem:[#allocation2] sm:$0xff] }
  0x14   :  { %v29_v1 = vshrl.u32 %v28_v0, 9  ;;  %v357_v18 = vmov 2475754826   ;;  %v358_v20 = vmov 2131351028   ;;  %v24_v57 = vshrl.u32 %v23_v55, 9 }
  0x15   :  { %v359_v26 = vmov 2102212464   ;;  %v360_v29 = vmov 920167782   ;;  %v361_v32 = vmov 1326507024  }
  0x16   :  { %v30_v2 = vor.u32 1065353216, %v29_v1  ;;  %v25_v61 = vor.u32 1065353216, %v24_v57  ;;  %s362_s0 = smov [#allocation5]  }
  0x17   :  { %s262_s20 = sshll.u32 %s362_s0, 4  ;;  %s263_s20 = int_to_ptr.vmem [resolvable:$true] %s262_s20 }
  0x18   :  { %v274_v3 = vadd.f32 -1.0, %v30_v2  ;;  %v32_v0 = vsub.f32 2.0, %v25_v61  ;;  %s327_s21 = scalar_lea.vmem %s263_s20, 256  ;;  %p332_p9 = scmp.lt.s32.totalorder %s263_s20, %s263_s20 }
  0x19   :  { %p328_p8 = scmp.ne.s32.totalorder %s263_s20, %s327_s21  ;;  %p333_p10 = scmp.lt.s32.totalorder %s327_s21, %s327_s21 }
  0x1a   :  { %v388_v4 = vmul.f32 6.2831855, %v274_v3  ;;  %297 = vlog2.f32 %v32_v0 }
  0x1b   :  { %p334_p11 = por %p333_p10, %p332_p9 }
  0x1c   :  { %v48_v5 = vand.u32 2139095040, %v388_v4  ;;  %v45_v6 = vand.u32 2147483647, %v388_v4  ;;  %vm47_vm7 = vcmp.lt.s32.totalorder %v388_v4, 0 }
  0x1d   :  { %p335_p12 = pnand %p334_p11, %p328_p8 }
  0x1e   :  { %v49_v7 = vshrl.u32 %v48_v5, 23  ;;  %v52_v9 = vand.u32 8388607, %v45_v6  ;;  %vm46_vm8 = vcmp.le.f32.partialorder %v45_v6, 0.7853982 }
  0x20   :  { %v275_v8 = vadd.s32 4294967169, %v49_v7  ;;  %v53_v11 = vor.u32 8388608, %v52_v9 }
  0x22   :  { %v55_v10 = vadd.s32 1, %v275_v8  ;;  %v93_v22 = vshll.u32 %v53_v11, 8 }
  0x24   :  { %vm56_vm0 = vcmp.gt.s32.totalorder %v55_v10, 0 }
  0x25   :  { %v57_v12 = vsel %vm56_vm0, %v55_v10, 0  ;;  %v298_v10 = vpop.eup %297 }
  0x26   :  { %v59_v13 = vand.u32 31, %v57_v12  ;;  %v58_v14 = vshrl.u32 %v57_v12, 5 }
  0x28   :  { %v60_v15 = vsub.s32 32, %v59_v13  ;;  %v62_v17 = vshll.u32 %v356_v16, %v59_v13  ;;  %v65_v19 = vshll.u32 %v357_v18, %v59_v13  ;;  %v68_v21 = vshll.u32 %v358_v20, %v59_v13 }
  0x29   :  { %v71_v28 = vshll.u32 %v359_v26, %v59_v13  ;;  %v74_v31 = vshll.u32 %v360_v29, %v59_v13  ;;  %vm77_vm1 = vcmp.lt.s32.totalorder %v58_v14, 1  ;;  %vm78_vm2 = vcmp.lt.s32.totalorder %v58_v14, 2 }
  0x2a   :  { %v61_v23 = vshrl.u32 %v356_v16, %v60_v15  ;;  %v63_v24 = vshrl.u32 %v357_v18, %v60_v15  ;;  %v66_v25 = vshrl.u32 %v358_v20, %v60_v15  ;;  %v69_v27 = vshrl.u32 %v359_v26, %v60_v15 }
  0x2b   :  { %v72_v30 = vshrl.u32 %v360_v29, %v60_v15  ;;  %v75_v33 = vshrl.u32 %v361_v32, %v60_v15  ;;  %vm79_vm3 = vcmp.lt.s32.totalorder %v58_v14, 3  ;;  %vm80_vm4 = vcmp.lt.s32.totalorder %v58_v14, 4 }
  0x2c   :  { %v64_v34 = vor.u32 %v63_v24, %v62_v17  ;;  %v67_v35 = vor.u32 %v66_v25, %v65_v19  ;;  %v70_v36 = vor.u32 %v69_v27, %v68_v21  ;;  %v36_v15 = vmul.f32 0.6931472, %v298_v10 }
  0x2d   :  { %v73_v37 = vor.u32 %v72_v30, %v71_v28  ;;  %v76_v38 = vor.u32 %v75_v33, %v74_v31 }
  0x2e   :  { %v81_v39 = vsel %vm77_vm1, %v61_v23, %v64_v34  ;;  %v85_v40 = vsel %vm77_vm1, %v64_v34, %v67_v35  ;;  %v89_v41 = vsel %vm77_vm1, %v67_v35, %v70_v36  ;;  %v82_v42 = vsel %vm80_vm4, %v70_v36, 2102212464 }
  0x2f   :  { %v86_v43 = vsel %vm80_vm4, %v73_v37, 920167782  ;;  %v90_v44 = vsel %vm80_vm4, %v76_v38, 1326507024  ;;  %v83_v45 = vsel %vm79_vm3, %v67_v35, %v82_v42  ;;  %v37_v20 = vmul.f32 -2.0, %v36_v15 }
  0x30   :  { %v87_v46 = vsel %vm79_vm3, %v70_v36, %v86_v43  ;;  %v91_v47 = vsel %vm79_vm3, %v73_v37, %v90_v44  ;;  %v84_v48 = vsel %vm78_vm2, %v81_v39, %v83_v45  ;;  %vm137_vm1 = vweird.f32 %v388_v4 }
  0x31   :  { %v88_v49 = vsel %vm78_vm2, %v85_v40, %v87_v46  ;;  %v92_v50 = vsel %vm78_vm2, %v89_v41, %v91_v47  ;;  %v100_v56 = vmul.u32 %v93_v22, %v84_v48  ;;  %299 = vrsqrt.f32 %v37_v20 }
  0x32   :  { %v394_v51 = vmul.u32.u64.low %v93_v22, %v92_v50  ;;  %v395_v52 = vmul.u32.u64.high %v93_v22, %v92_v50, %v394_v51  ;;  %v397_v53 = vmul.u32.u64.low %v93_v22, %v88_v49  ;;  %v398_v54 = vmul.u32.u64.high %v93_v22, %v88_v49, %v397_v53 }
  0x33   :  { %vm40_vm9 = vcmp.eq.f32.partialorder %v37_v20, inf  ;;  %vm42_vm10 = vcmp.eq.f32.partialorder %v37_v20, 0.0  ;;  %v43_v37 = vand.u32 2147483648, %v37_v20 }
  0x34   :  { %vm102_vm5 = vc.u32 %v395_v52, %v397_v53  ;;  %v103_v58 = vadd.s32 1, %v398_v54  ;;  %v101_v9 = vadd.s32 %v397_v53, %v395_v52 }
  0x36   :  { %v104_v59 = vsel %vm102_vm5, %v103_v58, %v398_v54 }
  0x37   :  { %v105_v60 = vadd.s32 %v104_v59, %v100_v56 }
  0x39   :  { %v106_v62 = vadd.s32 536870912, %v105_v60 }
  0x3b   :  { %v107_v63 = vshrl.u32 %v106_v62, 30  ;;  %v300_v32 = vpop.eup %299 }
  0x3c   :  { %v39_v35 = vmul.f32 %v300_v32, %v37_v20 }
  0x3d   :  { %v108_v1 = vshll.u32 %v107_v63, 30  ;;  %v131_v24 = vsub.s32 4, %v107_v63 }
  0x3e   :  { %v41_v38 = vsel %vm40_vm9, %v37_v20, %v39_v35 }
  0x3f   :  { %v109_v2 = vsub.s32 %v105_v60, %v108_v1  ;;  %v132_v27 = vsel %vm47_vm7, %v131_v24, %v107_v63  ;;  %v44_v43 = vsel %vm42_vm10, %v43_v37, %v41_v38 }
  0x40   :  { %v134_v30 = vsel %vm46_vm8, 0, %v132_v27 }
  0x41   :  { %v111_v3 = vsub.s32 0, %v109_v2  ;;  %v243_v31 = vadd.s32 3, %v134_v30  ;;  %v138_v33 = vand.u32 3, %v134_v30 }
  0x43   :  { %v276_v5 = vmin.u32 %v111_v3, %v109_v2  ;;  %v244_v34 = vand.u32 3, %v243_v31  ;;  %vm143_vm11 = vcmp.eq.s32.totalorder %v138_v33, 2  ;;  %vm140_vm13 = vcmp.eq.s32.totalorder %v138_v33, 0 }
  0x44   :  { %vm139_vm15 = vcmp.lt.s32.totalorder %v138_v33, 2 }
  0x45   :  { %v113_v7 = vclz %v276_v5  ;;  %vm249_vm12 = vcmp.eq.s32.totalorder %v244_v34, 2  ;;  %vm246_vm14 = vcmp.eq.s32.totalorder %v244_v34, 0  ;;  %vm245_vm0 = vcmp.lt.s32.totalorder %v244_v34, 2 }
  0x47   :  { %v277_v8 = vadd.s32 4294967294, %v113_v7 }
  0x49   :  { %vm278_vm6 = vcmp.lt.s32.totalorder %v277_v8, 0 }
  0x4a   :  { %v116_v11 = vsel %vm278_vm6, 0, %v277_v8 }
  0x4b   :  { %v117_v12 = vsub.s32 32, %v116_v11  ;;  %v118_v13 = vshll.u32 %v109_v2, %v116_v11  ;;  %v121_v14 = vsub.s32 4294967266, %v116_v11 }
  0x4d   :  { %v119_v16 = vshrl.u32 %v101_v9, %v117_v12  ;;  %v122_v17 = vadd.s32 127, %v121_v14 }
  0x4f   :  { %v120_v18 = vor.u32 %v119_v16, %v118_v13  ;;  %v123_v19 = vshll.u32 %v122_v17, 23 }
  0x51   :  { %v124_v21 = vor.u32 4788187, %v123_v19  ;;  %v127_v22 = vcvt.s32.f32 %v120_v18 }
  0x53   :  { %v125_v23 = vand.u32 2147483647, %v124_v21 }
  0x55   :  { %v128_v25 = vmul.f32 %v127_v22, %v125_v23 }
  0x57   :  { %v129_v26 = vxor.u32 2147483648, %v128_v25 }
  0x59   :  { %v130_v28 = vsel %vm47_vm7, %v129_v26, %v128_v25 }
  0x5a   :  { %v133_v29 = vsel %vm46_vm8, %v388_v4, %v130_v28 }
  0x5b   :  { %301 = vcosq.f32 %v133_v29 }
  0x5c   :  { %303 = vsinq.f32 %v133_v29 }
  0x65   :  { %v302_v36 = vpop.eup %301 }
  0x66   :  { %v304_v6 = vpop.eup %303  ;;  %v144_v39 = vxor.u32 2147483648, %v302_v36 }
  0x67   :  { %v141_v40 = vxor.u32 2147483648, %v304_v6 }
  0x68   :  { %v145_v41 = vsel %vm143_vm11, %v144_v39, %v304_v6  ;;  %v251_v42 = vsel %vm249_vm12, %v144_v39, %v304_v6 }
  0x69   :  { %v142_v44 = vsel %vm140_vm13, %v302_v36, %v141_v40  ;;  %v248_v45 = vsel %vm246_vm14, %v302_v36, %v141_v40 }
  0x6a   :  { %v146_v46 = vsel %vm139_vm15, %v142_v44, %v145_v41  ;;  %v252_v47 = vsel %vm245_vm0, %v248_v45, %v251_v42 }
  0x6b   :  { %v147_v48 = vsel %vm137_vm1, nan, %v146_v46  ;;  %v253_v49 = vsel %vm137_vm1, nan, %v252_v47 }
  0x6c   :  { %v148_v50 = vmul.f32 %v147_v48, %v44_v43  ;;  %v254_v51 = vmul.f32 %v253_v49, %v44_v43 }
  0x6e   :  { %149 = vst [vmem:[#allocation5] sm:$0xff] %v148_v50  ;;  %256 = vst [vmem:[#allocation5 + $0x8] sm:$0xff] %v254_v51 }
  0x6f   :  { %338 = shalt.err (!%p335_p12)
}
  0x70   :  { %s339_s24 = scalar_lea.hbm %s425_s1, 256 }
  0x71   :  { %p340_p13 = scmp.ne.s32.totalorder %s425_s1, %s339_s24  ;;  %p343_p0 = scmp.lt.u32.totalorder %s339_s24, %s425_s1 }
  0x73   :  { %p345_p1 = pnand %p343_p0, %p340_p13 }
  0x75   :  { %348 = shalt.err (!%p345_p1)
}
  0x76   :  { %268 = dma.vmem_to_hbm [thread:$0]  %s263_s20, 256, %s425_s1, [#allocation4], %s354_s16, %s354_s16, %s355_s17  }
  0x77   :  { %351 = dma.done.wait [#allocation4], 256  }
  0x78   :  { %352 = vsyncadd [#allocation4], 4294967040 }
  0x79   :  { %272 = vsyncpa [#allocation3], 1 }
  0x7a   :  { %273 = vsyncpa [#allocation4], 1 }

</bundles_post_ra>
